<compile_context>
chip_gen: v7x
topology: tpu7x:2x2x1
jax: 0.10.0
libtpu: 0.0.40
codegen_flags: <defaults>
</compile_context>

<pallas_src>
import jax
import jax.numpy as jnp
from jax.experimental import pallas as pl
from jax.experimental.pallas import tpu as pltpu


def _round_up(x, m):
    return ((x + m - 1) // m) * m


def _mlp_kernel(x_ref, w12_ref, b12_ref, w3_ref, b3_ref, o_ref, acc_ref):
    # grid = (batch_tiles, hidden_chunks); hidden-chunk axis is the reduction.
    h = pl.program_id(1)

    @pl.when(h == 0)
    def _():
        # Fold the l3 bias into the accumulator init.
        acc_ref[...] = jnp.broadcast_to(b3_ref[...], acc_ref.shape)

    x = x_ref[...]                                   # (tile_b, F) compute dtype
    tile_h = w3_ref.shape[1]

    # Fused gate/up projection: one MXU matmul of width 2*tile_h, f32 accum.
    h12 = jnp.dot(x, w12_ref[0], preferred_element_type=jnp.float32)
    h12 = h12 + b12_ref[0]                           # (tile_b, 2*tile_h) f32
    h1 = h12[:, :tile_h]                             # l1(x) chunk
    h2 = h12[:, tile_h:]                             # l2(x) chunk

    # SiLU gate in f32 (sigmoid goes to the EUP slot; v5e has no bf16 VPU).
    gated = h1 * (h2 * jax.nn.sigmoid(h2))

    # Down projection chunk, accumulated in f32 scratch.
    acc_ref[...] += jnp.dot(gated.astype(w3_ref.dtype), w3_ref[0],
                            preferred_element_type=jnp.float32)

    @pl.when(h == pl.num_programs(1) - 1)
    def _():
        o_ref[...] = acc_ref[...].astype(o_ref.dtype)


def mlp_forward(x, w1, b1, w2, b2, w3, b3, *,
                tile_b=None, tile_h=None,
                compute_dtype=jnp.bfloat16, out_dtype=None):
    """x: [B, F]; w1,w2: [F, H]; w3: [H, C]; b1,b2: [1, H] or [H]; b3: [1, C] or [C].

    Returns [B, C]. compute_dtype=bf16 uses the high-throughput MXU path on
    v6e/v7x (accumulation stays f32); compute_dtype=f32 is the exact path.
    """
    B, F = x.shape
    H = w1.shape[1]
    C = w3.shape[1]
    out_dtype = x.dtype if out_dtype is None else out_dtype
    cd = compute_dtype

    # ---- MXU-aligned tiles ---------------------------------------------------
    # Adaptive batch tile: no pointless padding for small B, 256-row MXU tiles
    # for large B (keeps grid_b >= 2 so both v7x TensorCores stay fed).
    if tile_b is None:
        tile_b = _round_up(max(B, 8), 8) if B <= 256 else 256
    tile_b = _round_up(max(tile_b, 8), 8)
    # tile_h multiple of 128 -> 2*tile_h is lane-aligned and the h1/h2 split
    # lands exactly on a vreg-lane boundary.
    if tile_h is None:
        tile_h = min(512, _round_up(H, 128))
    tile_h = _round_up(tile_h, 128)

    B_pad = _round_up(B, tile_b)
    H_pad = _round_up(H, tile_h)
    C_pad = _round_up(C, 128)          # lane-dense output -> unmasked stores
    Hc = H_pad // tile_h
    grid = (B_pad // tile_b, Hc)

    # ---- one-time layout plumbing (pad + fuse gate/up weights) --------------
    f32 = jnp.float32
    xp = jnp.zeros((B_pad, F), cd).at[:B, :].set(x.astype(cd))

    w1p = jnp.zeros((F, H_pad), cd).at[:, :H].set(w1.astype(cd))
    w2p = jnp.zeros((F, H_pad), cd).at[:, :H].set(w2.astype(cd))
    # per-H-chunk fusion: (Hc, F, 2*tile_h); [..., :tile_h]=w1, [..., tile_h:]=w2
    w12 = jnp.concatenate([w1p.reshape(F, Hc, tile_h),
                           w2p.reshape(F, Hc, tile_h)], axis=-1).transpose(1, 0, 2)

    b1p = jnp.zeros((H_pad,), f32).at[:H].set(b1.reshape(-1).astype(f32))
    b2p = jnp.zeros((H_pad,), f32).at[:H].set(b2.reshape(-1).astype(f32))
    b12 = jnp.concatenate([b1p.reshape(Hc, 1, tile_h),
                           b2p.reshape(Hc, 1, tile_h)], axis=-1)   # (Hc,1,2*tile_h)

    w3p = jnp.zeros((H_pad, C_pad), cd).at[:H, :C].set(w3.astype(cd))
    w3r = w3p.reshape(Hc, tile_h, C_pad)                            # (Hc,tile_h,Cp)
    b3p = jnp.zeros((1, C_pad), f32).at[:, :C].set(b3.reshape(1, -1).astype(f32))

    # ---- explicit VMEM budget (blocks are double-buffered by the pipeline) --
    isz = jnp.dtype(cd).itemsize
    osz = jnp.dtype(out_dtype).itemsize
    block_bytes = (tile_b * F * isz            # x tile
                   + F * 2 * tile_h * isz      # fused w12 chunk
                   + 2 * tile_h * 4            # fused bias chunk
                   + tile_h * C_pad * isz      # w3 chunk
                   + C_pad * 4                 # b3
                   + tile_b * C_pad * osz)     # out tile
    scratch_bytes = tile_b * C_pad * 4         # f32 accumulator
    vmem_limit = int(min(max(2 * block_bytes + scratch_bytes + (8 << 20),
                             32 << 20), 56 << 20))

    out_padded = pl.pallas_call(
        _mlp_kernel,
        out_shape=jax.ShapeDtypeStruct((B_pad, C_pad), out_dtype),
        grid_spec=pltpu.PrefetchScalarGridSpec(
            num_scalar_prefetch=0,
            grid=grid,
            in_specs=[
                pl.BlockSpec((tile_b, F), lambda i, h: (i, 0)),            # x
                pl.BlockSpec((1, F, 2 * tile_h), lambda i, h: (h, 0, 0)),  # w12
                pl.BlockSpec((1, 1, 2 * tile_h), lambda i, h: (h, 0, 0)),  # b12
                pl.BlockSpec((1, tile_h, C_pad), lambda i, h: (h, 0, 0)),  # w3
                pl.BlockSpec((1, C_pad), lambda i, h: (0, 0)),             # b3
            ],
            out_specs=pl.BlockSpec((tile_b, C_pad), lambda i, h: (i, 0)),
            scratch_shapes=[pltpu.VMEM((tile_b, C_pad), jnp.float32)],
        ),
        compiler_params=pltpu.CompilerParams(
            dimension_semantics=("parallel", "arbitrary"),
            vmem_limit_bytes=vmem_limit,
        ),
    )(xp, w12, b12, w3r, b3p)

    return out_padded[:B, :C]


def mlp_reference(x, w1, b1, w2, b2, w3, b3):
    h1 = x @ w1 + b1
    h2 = x @ w2 + b2
    return (jax.nn.silu(h2) * h1) @ w3 + b3


def _make_params(key, in_features, hidden_size, num_cls):
    k1, kb1, k2, kb2, k3, kb3 = jax.random.split(key, 6)
    s1 = 1.0 / jnp.sqrt(in_features)
    s3 = 1.0 / jnp.sqrt(hidden_size)
    w1 = jax.random.uniform(k1, (in_features, hidden_size), jnp.float32, -s1, s1)
    b1 = jax.random.uniform(kb1, (1, hidden_size), jnp.float32, -s1, s1)
    w2 = jax.random.uniform(k2, (in_features, hidden_size), jnp.float32, -s1, s1)
    b2 = jax.random.uniform(kb2, (1, hidden_size), jnp.float32, -s1, s1)
    w3 = jax.random.uniform(k3, (hidden_size, num_cls), jnp.float32, -s3, s3)
    b3 = jax.random.uniform(kb3, (1, num_cls), jnp.float32, -s3, s3)
    return w1, b1, w2, b2, w3, b3


if __name__ == "__main__":
    key = jax.random.PRNGKey(0)
    kx, kp, kx2, kp2 = jax.random.split(key, 4)

    # ---- Test 1: small shapes matching the module's forward -----------------
    batch, in_features, hidden_size, num_cls = 8, 32, 64, 16
    x = jax.random.normal(kx, (batch, in_features), dtype=jnp.float32)
    w1, b1, w2, b2, w3, b3 = _make_params(kp, in_features, hidden_size, num_cls)
    ref = mlp_reference(x, w1, b1, w2, b2, w3, b3)

    # Exact path (f32 compute) — tight tolerance.
    out_f32 = jax.block_until_ready(
        mlp_forward(x, w1, b1, w2, b2, w3, b3, compute_dtype=jnp.float32))
    assert out_f32.shape == (batch, num_cls)
    assert jnp.allclose(out_f32, ref, atol=2e-5, rtol=2e-5), "f32 mismatch vs reference"

    # High-throughput path (bf16 MXU inputs, f32 accumulation) — looser tolerance.
    out_bf16 = jax.block_until_ready(
        mlp_forward(x, w1, b1, w2, b2, w3, b3, compute_dtype=jnp.bfloat16))
    assert out_bf16.shape == (batch, num_cls)
    assert jnp.allclose(out_bf16, ref, atol=5e-2, rtol=5e-2), "bf16 mismatch vs reference"

    # ---- Test 2: exercise the multi-chunk hidden reduction (Hc > 1) ---------
    batch2, in2, hid2, cls2 = 16, 64, 256, 10
    x2 = jax.random.normal(kx2, (batch2, in2), dtype=jnp.float32)
    p2 = _make_params(kp2, in2, hid2, cls2)
    ref2 = mlp_reference(x2, *p2)
    out2 = jax.block_until_ready(
        mlp_forward(x2, *p2, compute_dtype=jnp.float32, tile_h=128))  # Hc = 2
    assert out2.shape == (batch2, cls2)
    assert jnp.allclose(out2, ref2, atol=2e-5, rtol=2e-5), "multi-chunk mismatch"

    print("KERNEL_OK")
</pallas_src>

<mosaic_0001>
module attributes {stable_mosaic.version = 11 : i64} {
  func.func @_mlp_kernel(%arg0: i32, %arg1: i32, %arg2: memref<8x32xf32, #tpu.memory_space<vmem>>, %arg3: memref<1x32x256xf32, #tpu.memory_space<vmem>>, %arg4: memref<1x1x256xf32, #tpu.memory_space<vmem>>, %arg5: memref<1x128x128xf32, #tpu.memory_space<vmem>>, %arg6: memref<1x128xf32, #tpu.memory_space<vmem>>, %arg7: memref<8x128xf32, #tpu.memory_space<vmem>>, %arg8: memref<8x128xf32, #tpu.memory_space<vmem>>) attributes {dimension_semantics = [#tpu.dimension_semantics<parallel>, #tpu.dimension_semantics<arbitrary>], iteration_bounds = array<i64: 1, 1>, scalar_prefetch = 0 : i64, scratch_operands = 1 : i64, tpu.core_type = #tpu.core_type<tc>, window_params = [{transform_indices = @transform_0, window_bounds = array<i64: 8, 32>}, {transform_indices = @transform_1, window_bounds = array<i64: 1, 32, 256>}, {transform_indices = @transform_2, window_bounds = array<i64: 1, 1, 256>}, {transform_indices = @transform_3, window_bounds = array<i64: 1, 128, 128>}, {pipeline_mode = #tpu.pipeline_mode<synchronous>, transform_indices = @transform_4, window_bounds = array<i64: 1, 128>}, {transform_indices = @transform_5, window_bounds = array<i64: 8, 128>}]} {
    %c0_i32 = arith.constant 0 : i32
    %0 = arith.cmpi eq, %arg1, %c0_i32 : i32
    %1 = arith.extui %0 : i1 to i32
    %c0_i32_0 = arith.constant 0 : i32
    %2 = arith.cmpi ne, %1, %c0_i32_0 : i32
    scf.if %2 {
      %c0_19 = arith.constant 0 : index
      %c0_20 = arith.constant 0 : index
      %29 = vector.load %arg6[%c0_19, %c0_20] : memref<1x128xf32, #tpu.memory_space<vmem>>, vector<1x128xf32>
      %30 = vector.shape_cast %29 : vector<1x128xf32> to vector<1x128xf32>
      %31 = vector.broadcast %30 : vector<1x128xf32> to vector<8x128xf32>
      %c0_21 = arith.constant 0 : index
      %c0_22 = arith.constant 0 : index
      %32 = vector.load %arg8[%c0_21, %c0_22] : memref<8x128xf32, #tpu.memory_space<vmem>>, vector<8x128xf32>
      tpu.vector_store %arg8[%c0_21, %c0_22], %31 {strides = array<i32>} : memref<8x128xf32, #tpu.memory_space<vmem>>, vector<8x128xf32>,
    } else {
    }
    %c0 = arith.constant 0 : index
    %c0_1 = arith.constant 0 : index
    %3 = vector.load %arg2[%c0, %c0_1] : memref<8x32xf32, #tpu.memory_space<vmem>>, vector<8x32xf32>
    %c0_2 = arith.constant 0 : index
    %c0_3 = arith.constant 0 : index
    %c0_4 = arith.constant 0 : index
    %4 = vector.load %arg3[%c0_2, %c0_3, %c0_4] : memref<1x32x256xf32, #tpu.memory_space<vmem>>, vector<1x32x256xf32>
    %5 = vector.shape_cast %4 : vector<1x32x256xf32> to vector<32x256xf32>
    %cst = arith.constant dense<0.000000e+00> : vector<8x256xf32>
    %6 = tpu.matmul %3, %5, %cst {dimension_numbers = #tpu.dot_dimension_numbers<[1], [0], [0], [1], [0, 0, 1, 1], [], []>} : vector<8x32xf32>, vector<32x256xf32>, vector<8x256xf32> -> vector<8x256xf32>
    %c0_5 = arith.constant 0 : index
    %c0_6 = arith.constant 0 : index
    %c0_7 = arith.constant 0 : index
    %7 = vector.load %arg4[%c0_5, %c0_6, %c0_7] : memref<1x1x256xf32, #tpu.memory_space<vmem>>, vector<1x1x256xf32>
    %8 = vector.shape_cast %7 : vector<1x1x256xf32> to vector<1x256xf32>
    %9 = vector.broadcast %8 : vector<1x256xf32> to vector<8x256xf32>
    %10 = arith.addf %6, %9 : vector<8x256xf32>
    %11 = vector.extract_strided_slice %10 {offsets = [0, 0], sizes = [8, 128], strides = [1, 1]} : vector<8x256xf32> to vector<8x128xf32>
    %12 = vector.extract_strided_slice %10 {offsets = [0, 128], sizes = [8, 128], strides = [1, 1]} : vector<8x256xf32> to vector<8x128xf32>
    %13 = arith.negf %12 : vector<8x128xf32>
    %14 = math.exp %13 : vector<8x128xf32>
    %cst_8 = arith.constant 1.000000e+00 : f32
    %15 = vector.broadcast %cst_8 : f32 to vector<8x128xf32>
    %16 = arith.addf %15, %14 : vector<8x128xf32>
    %17 = arith.divf %15, %16 : vector<8x128xf32>
    %18 = arith.mulf %12, %17 : vector<8x128xf32>
    %19 = arith.mulf %11, %18 : vector<8x128xf32>
    %c0_9 = arith.constant 0 : index
    %c0_10 = arith.constant 0 : index
    %20 = vector.load %arg8[%c0_9, %c0_10] : memref<8x128xf32, #tpu.memory_space<vmem>>, vector<8x128xf32>
    %c0_11 = arith.constant 0 : index
    %c0_12 = arith.constant 0 : index
    %c0_13 = arith.constant 0 : index
    %21 = vector.load %arg5[%c0_11, %c0_12, %c0_13] : memref<1x128x128xf32, #tpu.memory_space<vmem>>, vector<1x128x128xf32>
    %22 = vector.shape_cast %21 : vector<1x128x128xf32> to vector<128x128xf32>
    %cst_14 = arith.constant dense<0.000000e+00> : vector<8x128xf32>
    %23 = tpu.matmul %19, %22, %cst_14 {dimension_numbers = #tpu.dot_dimension_numbers<[1], [0], [0], [1], [0, 0, 1, 1], [], []>} : vector<8x128xf32>, vector<128x128xf32>, vector<8x128xf32> -> vector<8x128xf32>
    %24 = arith.addf %20, %23 : vector<8x128xf32>
    %c0_15 = arith.constant 0 : index
    %c0_16 = arith.constant 0 : index
    %25 = vector.load %arg8[%c0_15, %c0_16] : memref<8x128xf32, #tpu.memory_space<vmem>>, vector<8x128xf32>
    tpu.vector_store %arg8[%c0_15, %c0_16], %24 {strides = array<i32>} : memref<8x128xf32, #tpu.memory_space<vmem>>, vector<8x128xf32>,
    %c0_i32_17 = arith.constant 0 : i32
    %26 = arith.cmpi eq, %arg1, %c0_i32_17 : i32
    %27 = arith.extui %26 : i1 to i32
    %c0_i32_18 = arith.constant 0 : i32
    %28 = arith.cmpi ne, %27, %c0_i32_18 : i32
    scf.if %28 {
      %c0_19 = arith.constant 0 : index
      %c0_20 = arith.constant 0 : index
      %29 = vector.load %arg8[%c0_19, %c0_20] : memref<8x128xf32, #tpu.memory_space<vmem>>, vector<8x128xf32>
      %c0_21 = arith.constant 0 : index
      %c0_22 = arith.constant 0 : index
      %30 = vector.load %arg7[%c0_21, %c0_22] : memref<8x128xf32, #tpu.memory_space<vmem>>, vector<8x128xf32>
      tpu.vector_store %arg7[%c0_21, %c0_22], %29 {strides = array<i32>} : memref<8x128xf32, #tpu.memory_space<vmem>>, vector<8x128xf32>,
    } else {
    }
    return
  }
  func.func @transform_0(%arg0: i32, %arg1: i32) -> (i32, i32) {
    %c0_i32 = arith.constant 0 : i32
    %c0_i32_0 = arith.constant 0 : i32
    return %arg0, %c0_i32 : i32, i32
  }
  func.func @transform_1(%arg0: i32, %arg1: i32) -> (i32, i32, i32) {
    %c0_i32 = arith.constant 0 : i32
    %c0_i32_0 = arith.constant 0 : i32
    %c0_i32_1 = arith.constant 0 : i32
    return %arg1, %c0_i32, %c0_i32_0 : i32, i32, i32
  }
  func.func @transform_2(%arg0: i32, %arg1: i32) -> (i32, i32, i32) {
    %c0_i32 = arith.constant 0 : i32
    %c0_i32_0 = arith.constant 0 : i32
    %c0_i32_1 = arith.constant 0 : i32
    return %arg1, %c0_i32, %c0_i32_0 : i32, i32, i32
  }
  func.func @transform_3(%arg0: i32, %arg1: i32) -> (i32, i32, i32) {
    %c0_i32 = arith.constant 0 : i32
    %c0_i32_0 = arith.constant 0 : i32
    %c0_i32_1 = arith.constant 0 : i32
    return %arg1, %c0_i32, %c0_i32_0 : i32, i32, i32
  }
  func.func @transform_4(%arg0: i32, %arg1: i32) -> (i32, i32) {
    %c0_i32 = arith.constant 0 : i32
    %c0_i32_0 = arith.constant 0 : i32
    %c0_i32_1 = arith.constant 0 : i32
    return %c0_i32, %c0_i32_0 : i32, i32
  }
  func.func @transform_5(%arg0: i32, %arg1: i32) -> (i32, i32) {
    %c0_i32 = arith.constant 0 : i32
    %c0_i32_0 = arith.constant 0 : i32
    return %arg0, %c0_i32 : i32, i32
  }
}

</mosaic_0001>

<bundles_post_ra>
// kernel: tpu_custom_call.1
= control target key start
LH: loop header
LB: loop body
LE: loop exit
PB: predicated region body
PF: predicated region fallthrough
CT: control target
= control target key end

     0   :  { %10 = vsyncpa [#allocation4], 0  ;;  %s579_s0 = inlined_call_operand.hbm [shape: f32[8,32], index: 0, kind: input, shape index: {}]   ;;  %s580_s1 = inlined_call_operand.hbm [shape: f32[1,32,256], index: 1, kind: input, shape index: {}]   ;;  %s581_s2 = inlined_call_operand.vmem [shape: f32[1,1,256], index: 2, kind: input, shape index: {}]   ;;  %s582_s3 = inlined_call_operand.hbm [shape: f32[1,128,128], index: 3, kind: input, shape index: {}]   ;;  %s583_s4 = inlined_call_operand.vmem [shape: f32[1,128], index: 4, kind: input, shape index: {}]   ;;  %s584_s5 = inlined_call_operand.hbm [shape: f32[8,128], index: 5, kind: output, shape index: {}]  }
   0x1   :  { %11 = vsyncpa [#allocation7], 0 }
   0x2   :  { %12 = vsyncpa [#allocation5], 0  ;;  %s482_s18 = smov [#allocation6]   ;;  %s388_s22 = scalar_lea.hbm %s580_s1, 1024 }
   0x3   :  { %s28_s19 = sshll.u32 %s482_s18, 4  ;;  %p389_p0 = scmp.ne.s32.totalorder %s580_s1, %s388_s22  ;;  %s29_s19 = int_to_ptr.vmem [resolvable:$true] %s28_s19 }
   0x4   :  { %p392_p1 = scmp.lt.u32.totalorder %s388_s22, %s580_s1 }
   0x6   :  { %p394_p2 = pnand %p392_p1, %p389_p0 }
   0x8   :  { %397 = shalt.err (!%p394_p2)
}
   0x9   :  { %s398_s27 = scalar_lea.vmem %s29_s19, 1024  ;;  %p403_p4 = scmp.lt.s32.totalorder %s29_s19, %s29_s19 }
   0xa   :  { %p399_p3 = scmp.ne.s32.totalorder %s29_s19, %s398_s27  ;;  %p404_p5 = scmp.lt.s32.totalorder %s398_s27, %s398_s27 }
   0xc   :  { %p405_p6 = por %p404_p5, %p403_p4 }
   0xe   :  { %p406_p7 = pnand %p405_p6, %p399_p3 }
  0x10   :  { %409 = shalt.err (!%p406_p7)
}
  0x11   :  { %s483_s28 = smov 256   ;;  %s484_s29 = smov 16  }
  0x12   :  { %34 = dma.hbm_to_vmem [thread:$0]  %s580_s1, 1024, %s29_s19, [#allocation7], %s483_s28, %s483_s28, %s484_s29  }
  0x13   :  { %s485_s7 = smov [#allocation3]   ;;  %s486_s9 = smov [#allocation8]  }
  0x14   :  { %s19_s8 = sshll.u32 %s485_s7, 4  ;;  %s42_s10 = sshll.u32 %s486_s9, 4  ;;  %s20_s8 = int_to_ptr.vmem [resolvable:$true] %s19_s8  ;;  %s43_s10 = int_to_ptr.vmem [resolvable:$true] %s42_s10 }
  0x15   :  { %s410_s13 = scalar_lea.hbm %s579_s0, 128 }
  0x16   :  { %p411_p8 = scmp.ne.s32.totalorder %s579_s0, %s410_s13  ;;  %p414_p9 = scmp.lt.u32.totalorder %s410_s13, %s579_s0 }
  0x18   :  { %p416_p10 = pnand %p414_p9, %p411_p8 }
  0x1a   :  { %419 = shalt.err (!%p416_p10)
}
  0x1b   :  { %s420_s1 = scalar_lea.vmem %s20_s8, 128  ;;  %p425_p12 = scmp.lt.s32.totalorder %s20_s8, %s20_s8 }
  0x1c   :  { %p421_p11 = scmp.ne.s32.totalorder %s20_s8, %s420_s1  ;;  %p426_p13 = scmp.lt.s32.totalorder %s420_s1, %s420_s1 }
  0x1e   :  { %p427_p0 = por %p426_p13, %p425_p12 }
  0x20   :  { %p428_p1 = pnand %p427_p0, %p421_p11 }
  0x22   :  { %431 = shalt.err (!%p428_p1)
}
  0x23   :  { %22 = dma.hbm_to_vmem [thread:$0]  %s579_s0, 128, %s20_s8, [#allocation4]  }
  0x24   :  { %s432_s22 = scalar_lea.hbm %s582_s3, 2048 }
  0x25   :  { %p433_p2 = scmp.ne.s32.totalorder %s582_s3, %s432_s22  ;;  %p436_p3 = scmp.lt.u32.totalorder %s432_s22, %s582_s3 }
  0x27   :  { %p438_p4 = pnand %p436_p3, %p433_p2 }
  0x29   :  { %441 = shalt.err (!%p438_p4)
}
  0x2a   :  { %s442_s27 = scalar_lea.vmem %s43_s10, 2048  ;;  %p447_p6 = scmp.lt.s32.totalorder %s43_s10, %s43_s10 }
  0x2b   :  { %p443_p5 = scmp.ne.s32.totalorder %s43_s10, %s442_s27  ;;  %p448_p7 = scmp.lt.s32.totalorder %s442_s27, %s442_s27 }
  0x2d   :  { %p449_p8 = por %p448_p7, %p447_p6 }
  0x2f   :  { %p450_p9 = pnand %p449_p8, %p443_p5 }
  0x31   :  { %453 = shalt.err (!%p450_p9)
}
  0x32   :  { %s487_s0 = smov 128   ;;  %s488_s28 = smov 8  }
  0x33   :  { %48 = dma.hbm_to_vmem [thread:$0]  %s582_s3, 2048, %s43_s10, [#allocation7], %s487_s0, %s487_s0, %s488_s28  }
  0x34   :  { %476 = dma.done.wait [#allocation4], 128  }
  0x35   :  { %477 = vsyncadd [#allocation4], 4294967168 }
  0x36   :  { %478 = dma.done.wait [#allocation7], 3072  }
  0x37   :  { %479 = vsyncadd [#allocation7], 4294964224  ;;  %v489_v0 = vmov 0.0   ;;  %v74_v1 = vld [vmem:[#allocation6 + $0x8] sm:$0xff]  ;;  %v76_v2 = vld [vmem:[#allocation6 + $0x18] sm:$0xff]  ;;  %vm93_vm0 = vcmask 261120   ;;  %v83_v39 = vlaneseq }
  0x38   :  { %161 = vmatprep.mubr.f32.mxu0 %v489_v0  ;;  %v73_v3 = vld [vmem:[#allocation6] sm:$0xff]  ;;  %v341_v4 = vpack.c.bf16 %v76_v2, %v74_v1  ;;  %v75_v5 = vld [vmem:[#allocation6 + $0x10] sm:$0xff]  ;;  %v78_v6 = vld [vmem:[#allocation6 + $0x28] sm:$0xff]  ;;  %v490_v17 = vmov 0.0|0.0   ;;  %vm491_vm1 = vmmov 0  }
  0x39   :  { %v80_v7 = vld [vmem:[#allocation6 + $0x38] sm:$0xff]  ;;  %v343_v8 = vpack.c.bf16 %v75_v5, %v73_v3  ;;  %v77_v10 = vld [vmem:[#allocation6 + $0x20] sm:$0xff]  ;;  %v79_v11 = vld [vmem:[#allocation6 + $0x30] sm:$0xff]  ;;  %349 = vmatprep.subr.bf16.mxu1 %v490_v17  ;;  %338 = vmatprep.mubr.msk.f32.mxu1 %vm491_vm1, %v489_v0  ;;  %v84_v40 = vshrl.u32 %v83_v39, 7 }
  0x3a   :  { %v345_v9 = vpack.c.bf16 %v80_v7, %v78_v6  ;;  %342 = vmatprep.subr.bf16.mxu0 %v341_v4  ;;  %v347_v12 = vpack.c.bf16 %v79_v11, %v77_v10  ;;  %v72_v13 = vld [vmem:[#allocation3] sm:$0xff]  ;;  %v177_v14 = vld [vmem:[#allocation8] sm:$0xff]  ;;  %v178_v15 = vld [vmem:[#allocation8 + $0x8] sm:$0xff] }
  0x3b   :  { %344 = vmatpush1.bf16.msra.mxu0 %v343_v8  ;;  %v350_v16 = vpack.c.bf16 %v178_v15, %v177_v14  ;;  %v179_v18 = vld [vmem:[#allocation8 + $0x10] sm:$0xff]  ;;  %v180_v19 = vld [vmem:[#allocation8 + $0x18] sm:$0xff]  ;;  %v181_v21 = vld [vmem:[#allocation8 + $0x20] sm:$0xff]  ;;  %v89_v41 = vsub.s32 1, %v84_v40  ;;  %v85_v50 = vsub.s32 0, %v84_v40 }
  0x3c   :  { %346 = vmatprep.subr.bf16.mxu0 %v345_v9  ;;  %v353_v20 = vpack.c.bf16 %v180_v19, %v179_v18  ;;  %v182_v22 = vld [vmem:[#allocation8 + $0x28] sm:$0xff]  ;;  %v183_v24 = vld [vmem:[#allocation8 + $0x30] sm:$0xff]  ;;  %v184_v25 = vld [vmem:[#allocation8 + $0x38] sm:$0xff] }
  0x3d   :  { %351 = vmatpush3.bf16.msra.mxu1 %v350_v16  ;;  %v356_v23 = vpack.c.bf16 %v182_v22, %v181_v21  ;;  %v359_v26 = vpack.c.bf16 %v184_v25, %v183_v24  ;;  %v185_v27 = vld [vmem:[#allocation8 + $0x40] sm:$0xff]  ;;  %v186_v28 = vld [vmem:[#allocation8 + $0x48] sm:$0xff]  ;;  %v187_v30 = vld [vmem:[#allocation8 + $0x50] sm:$0xff] }
  0x3e   :  { %352 = vmatprep.subr.bf16.mxu1 %v490_v17  ;;  %v362_v29 = vpack.c.bf16 %v186_v28, %v185_v27  ;;  %v188_v31 = vld [vmem:[#allocation8 + $0x58] sm:$0xff]  ;;  %v189_v33 = vld [vmem:[#allocation8 + $0x60] sm:$0xff]  ;;  %v190_v34 = vld [vmem:[#allocation8 + $0x68] sm:$0xff] }
  0x3f   :  { %348 = vmatpush1.bf16.msra.mxu0 %v347_v12  ;;  %v365_v32 = vpack.c.bf16 %v188_v31, %v187_v30  ;;  %v368_v35 = vpack.c.bf16 %v190_v34, %v189_v33  ;;  %v191_v36 = vld [vmem:[#allocation8 + $0x70] sm:$0xff]  ;;  %v192_v37 = vld [vmem:[#allocation8 + $0x78] sm:$0xff] }
  0x40   :  { %v371_v38 = vpack.c.bf16 %v192_v37, %v191_v36  ;;  %v81_v42 = vld [vmem:[%s581_s2] sm:$0x3]  ;;  %s492_s2 = smov [#allocation9]  }
  0x41   :  { %354 = vmatpush3.bf16.msra.mxu1 %v353_v20  ;;  %v90_v43 = vrot.slane %v81_v42, %v89_v41  ;;  %v86_v51 = vrot.slane %v81_v42, %v85_v50  ;;  %v286_v56 = vld [vmem:[%s583_s4] ss:$0 sm:$0xff]  ;;  %s276_s9 = sshll.u32 %s492_s2, 4  ;;  %s277_s9 = int_to_ptr.vmem [resolvable:$true] %s276_s9 }
  0x42   :  { %287 = vmatmul.mubr.msk.f32.vlgmr.msra.gmra.mrb[0].mxu0 %vm93_vm0, %v72_v13  ;;  %355 = vmatprep.subr.bf16.mxu1 %v490_v17  ;;  %s454_s10 = scalar_lea.vmem %s277_s9, 128  ;;  %p459_p11 = scmp.lt.s32.totalorder %s277_s9, %s277_s9 }
  0x43   :  { %p455_p10 = scmp.ne.s32.totalorder %s277_s9, %s454_s10  ;;  %p460_p12 = scmp.lt.s32.totalorder %s454_s10, %s454_s10 }
  0x45   :  { %357 = vmatpush3.bf16.msra.mxu1 %v356_v23  ;;  %p461_p13 = por %p460_p12, %p459_p11 }
  0x46   :  { %358 = vmatprep.subr.bf16.mxu1 %v490_v17 }
  0x47   :  { %p462_p0 = pnand %p461_p13, %p455_p10 }
  0x49   :  { %360 = vmatpush3.bf16.msra.mxu1 %v359_v26 }
  0x4a   :  { %361 = vmatprep.subr.bf16.mxu1 %v490_v17 }
  0x4d   :  { %363 = vmatpush3.bf16.msra.mxu1 %v362_v29 }
  0x4e   :  { %364 = vmatprep.subr.bf16.mxu1 %v490_v17 }
  0x51   :  { %366 = vmatpush3.bf16.msra.mxu1 %v365_v32 }
  0x52   :  { %367 = vmatprep.subr.bf16.mxu1 %v490_v17 }
  0x55   :  { %369 = vmatpush3.bf16.msra.mxu1 %v368_v35 }
  0x56   :  { %370 = vmatprep.subr.bf16.mxu1 %v490_v17 }
  0x59   :  { %372 = vmatpush3.bf16.msra.mxu1 %v371_v38 }
 0x115   :  { %v163_v44 = vpop.f32.mrb[0].mxu0 }
 0x116   :  { %v165_v45 = vpop.f32.mrb[1].mxu0  ;;  %v164_v53 = vadd.f32 %v163_v44, %v86_v51 }
 0x117   :  { %v166_v46 = vadd.f32 %v165_v45, %v90_v43 }
 0x119   :  { %v288_v47 = vmul.f32 -1.442695, %v166_v46 }
 0x11b   :  { %384 = vpow2.f32 %v288_v47 }
 0x125   :  { %v385_v48 = vpop.eup %384 }
 0x126   :  { %v171_v49 = vadd.f32 1.0, %v385_v48 }
 0x128   :  { %386 = vrcp.f32 %v171_v49 }
 0x132   :  { %v387_v52 = vpop.eup %386 }
 0x133   :  { %v174_v54 = vmul.f32 %v387_v52, %v166_v46 }
 0x135   :  { %v175_v55 = vmul.f32 %v174_v54, %v164_v53 }
 0x137   :  { %339 = vmatmul.mubr.f32.vlgmr.msra.gmra.mrb[0].mxu1 %v175_v55 }
 0x20a   :  { %v259_v57 = vpop.f32.mrb[0].mxu1 }
 0x20b   :  { %v263_v58 = vadd.f32 %v286_v56, %v259_v57  ;;  %v340_v59 = vpop.f32.mrb[1].mxu1 }
 0x20d   :  { %269 = vst [vmem:[#allocation9] sm:$0xff] %v263_v58 }
 0x20e   :  { %465 = shalt.err (!%p462_p0)
}
 0x20f   :  { %s466_s13 = scalar_lea.hbm %s584_s5, 128 }
 0x210   :  { %p467_p1 = scmp.ne.s32.totalorder %s584_s5, %s466_s13  ;;  %p470_p2 = scmp.lt.u32.totalorder %s466_s13, %s584_s5 }
 0x212   :  { %p472_p3 = pnand %p470_p2, %p467_p1 }
 0x214   :  { %475 = shalt.err (!%p472_p3)
}
 0x215   :  { %279 = dma.vmem_to_hbm [thread:$0]  %s277_s9, 128, %s584_s5, [#allocation5]  }
 0x216   :  { %480 = dma.done.wait [#allocation5], 128  }
 0x217   :  { %481 = vsyncadd [#allocation5], 4294967168 }
 0x218   :  { %283 = vsyncpa [#allocation4], 1 }
 0x219   :  { %284 = vsyncpa [#allocation7], 1 }
 0x21a   :  { %285 = vsyncpa [#allocation5], 1 }

</bundles_post_ra>
